<compile_context>
chip_gen: v6e
topology: v6e:2x2x1
jax: 0.10.0
libtpu: 0.0.40
codegen_flags: <defaults>
</compile_context>

<pallas_src>
import math
from functools import partial

import numpy as np
import jax
import jax.numpy as jnp
from jax.experimental import pallas as pl
from jax.experimental.pallas import tpu as pltpu

LN_EPS = 1e-12   # the reference module explicitly uses nn.LayerNorm(dim, eps=1e-12)


# ----------------------------- in-kernel helpers -----------------------------
def _softmax_last(x):
    m = jnp.max(x, axis=-1, keepdims=True)
    e = jnp.exp(x - m)
    return e / jnp.sum(e, axis=-1, keepdims=True)


def _layernorm(x, gamma, beta, eps):
    mu = jnp.mean(x, axis=-1, keepdims=True)
    var = jnp.mean((x - mu) * (x - mu), axis=-1, keepdims=True)
    return (x - mu) * jax.lax.rsqrt(var + eps) * gamma + beta


# ------------------------------ fused Selector kernel ------------------------------
def _selector_kernel(bs_tile, n_select, topk,
                     q_ref, k_ref, v_ref, g_ref,
                     wq_ref, wk_ref, p_ref,
                     o_ref):
    dim = wk_ref.shape[1]
    feat = v_ref.shape[-1]

    # packed per-feature params: rows [bq, gq, betaq, bk, gk, betak] of an (8, dim) slab
    bq, gq, betaq = p_ref[0:1, :], p_ref[1:2, :], p_ref[2:3, :]
    bk, gk, betak = p_ref[3:4, :], p_ref[4:5, :], p_ref[5:6, :]

    # ---- Q path: Linear + LayerNorm (f32 accumulation / f32 LN) -------- (bs_tile, dim)
    q = jnp.dot(q_ref[...], wq_ref[...], preferred_element_type=jnp.float32) + bq
    q = _layernorm(q, gq, betaq, LN_EPS)

    # ---- K path: Linear + LayerNorm ------------------------------------ (bs_tile*n_select, dim)
    k = jnp.dot(k_ref[...], wk_ref[...], preferred_element_type=jnp.float32) + bk
    k = _layernorm(k, gk, betak, LN_EPS)
    k = k.reshape(bs_tile, n_select, dim)

    # ---- logits = K @ Q.unsqueeze(-1), softmax over n_select ------------ (bs_tile, n_select)
    logits = jnp.sum(k * q[:, None, :], axis=-1)
    x_probs = _softmax_last(logits)

    # ---- topk independent soft gumbel-softmax masks (tau = 1) ----------- (bs_tile, topk, n_select)
    # NOTE: as in the PyTorch reference, Gumbel noise is added to the softmax
    # PROBABILITIES (x_probs), not to raw logits, and tau = 1.
    masks = _softmax_last(x_probs[:, None, :] + g_ref[...])

    # ---- selected_segs = masks @ V : batched MXU contraction ------------ (bs_tile, topk, feat)
    v = v_ref[...]
    sel = jnp.einsum('bts,bsf->btf', masks.astype(v.dtype), v,
                     preferred_element_type=jnp.float32)

    # lane/sublane-dense output write: (bs_tile*topk, feat)
    o_ref[...] = sel.reshape(bs_tile * topk, feat).astype(o_ref.dtype)


# ------------------------------ tile-size heuristic ------------------------------
def _pick_bs_tile(bs, n_select, q_dim, dim, feat, topk, mxu_bytes):
    """Largest batch tile (divisor of bs, multiple of 8 unless == bs) whose
    double-buffered working set stays well under the scoped-VMEM limit of every
    TPU generation (v5e 16 MiB default, v7x 64 MiB physical)."""
    budget = 20 * 2**20
    cands = sorted({d for d in range(1, bs + 1)
                    if bs % d == 0 and (d % 8 == 0 or d == bs)})

    def est(d):
        tiles = (d * n_select * feat * mxu_bytes          # V tile
                 + d * n_select * dim * mxu_bytes         # K tile
                 + d * q_dim * mxu_bytes                  # Q tile
                 + d * topk * n_select * 4                # gumbel tile
                 + d * topk * feat * 4)                   # output tile
        weights = (q_dim * dim + dim * dim) * mxu_bytes + 8 * dim * 4
        live = d * n_select * (dim + feat) * 4 + d * topk * feat * 4
        return 2 * (tiles + weights) + live               # x2: double buffering

    ok = [d for d in cands if est(d) <= budget and d * n_select <= 1024]
    return ok[-1] if ok else cands[0]


# ----------------------------------- wrapper -----------------------------------
def selector_forward(params, Q, K, V, key, topk, mxu_dtype=jnp.bfloat16, bs_tile=None):
    """Selector.forward.  Q:(bs,q_dim,1)  K:(bs,n_select,dim)  V:(bs,n_select,...)"""
    bs, n_select, dim = K.shape
    q_dim = Q.shape[1]
    v_shape = V.shape
    f32 = jnp.float32

    # boundary casts + free reshapes (MXU operands in mxu_dtype, everything else f32)
    q2 = jnp.asarray(Q, f32)[..., 0].astype(mxu_dtype)                     # (bs, q_dim)
    k2 = jnp.asarray(K, f32).reshape(bs * n_select, dim).astype(mxu_dtype)  # (bs*n_select, dim)
    v3 = jnp.asarray(V, f32).reshape(bs, n_select, -1).astype(mxu_dtype)    # (bs, n_select, feat)
    feat = v3.shape[-1]

    wq = params["wq"].astype(mxu_dtype)
    wk = params["wk"].astype(mxu_dtype)
    packed = jnp.concatenate(
        [params["bq"], params["gq"], params["betaq"],
         params["bk"], params["gk"], params["betak"],
         jnp.zeros((2, dim), f32)], axis=0)                                 # (8, dim) f32

    # torch: gumbels = -empty_like(logits).exponential_().log(), one draw per topk iter.
    # TODO(synk): the reference's data-dependent NaN/Inf re-draw loop has no Pallas
    # equivalent; jax.random.gumbel never produces NaN/Inf in practice.
    gumbels = jax.random.gumbel(key, (bs, topk, n_select), dtype=f32)

    mxu_bytes = jnp.dtype(mxu_dtype).itemsize
    if bs_tile is None:
        bs_tile = _pick_bs_tile(bs, n_select, q_dim, dim, feat, topk, mxu_bytes)
    assert bs % bs_tile == 0 and (bs_tile == bs or bs_tile % 8 == 0), bs_tile
    grid = (bs // bs_tile,)

    flops = (2 * bs * q_dim * dim + 2 * bs * n_select * dim * dim
             + 2 * bs * topk * n_select * feat)
    transcendentals = bs * n_select * (1 + topk) + bs * (1 + n_select)
    bytes_accessed = ((q2.size + k2.size + v3.size + wq.size + wk.size) * mxu_bytes
                      + (gumbels.size + packed.size + bs * topk * feat) * 4)

    out = pl.pallas_call(
        partial(_selector_kernel, bs_tile, n_select, topk),
        out_shape=jax.ShapeDtypeStruct((bs * topk, feat), f32),
        grid=grid,
        in_specs=[
            pl.BlockSpec((bs_tile, q_dim), lambda i: (i, 0)),
            pl.BlockSpec((bs_tile * n_select, dim), lambda i: (i, 0)),
            pl.BlockSpec((bs_tile, n_select, feat), lambda i: (i, 0, 0)),
            pl.BlockSpec((bs_tile, topk, n_select), lambda i: (i, 0, 0)),
            pl.BlockSpec((q_dim, dim), lambda i: (0, 0)),   # weights stay resident
            pl.BlockSpec((dim, dim), lambda i: (0, 0)),
            pl.BlockSpec((8, dim), lambda i: (0, 0)),
        ],
        out_specs=pl.BlockSpec((bs_tile * topk, feat), lambda i: (i, 0)),
        compiler_params=pltpu.CompilerParams(
            dimension_semantics=("parallel",),
            vmem_limit_bytes=48 * 2**20),
        cost_estimate=pl.CostEstimate(flops=flops,
                                      transcendentals=transcendentals,
                                      bytes_accessed=bytes_accessed),
    )(q2, k2, v3, gumbels, wq, wk, packed)

    out = out.reshape(bs, topk, feat)
    if len(v_shape) == 5:                    # (bs, n_select, n_frame, obj_num, obj_dim)
        obj_num, obj_dim = v_shape[-2:]
        out = out.reshape(bs, -1, obj_num, obj_dim)
    return out


# ---------------------------- pure-JAX reference (for checking) ----------------------------
def selector_reference(params, Q, K, V, key, topk, mxu_dtype=jnp.float32):
    bs, n_select, dim = K.shape
    f32 = jnp.float32
    gumbels = jax.random.gumbel(key, (bs, topk, n_select), dtype=f32)

    def ln(x, g, b):
        mu = jnp.mean(x, -1, keepdims=True)
        var = jnp.mean((x - mu) ** 2, -1, keepdims=True)
        return (x - mu) * jax.lax.rsqrt(var + LN_EPS) * g + b

    q_in = jnp.squeeze(Q, -1).astype(f32).astype(mxu_dtype)
    k_in = K.astype(f32).reshape(-1, dim).astype(mxu_dtype)
    v_in = V.astype(f32).reshape(bs, n_select, -1).astype(mxu_dtype)

    q = jnp.dot(q_in, params["wq"].astype(mxu_dtype), preferred_element_type=f32) + params["bq"]
    q = ln(q, params["gq"], params["betaq"])
    k = jnp.dot(k_in, params["wk"].astype(mxu_dtype), preferred_element_type=f32) + params["bk"]
    k = ln(k, params["gk"], params["betak"]).reshape(bs, n_select, dim)
    logits = jnp.sum(k * q[:, None, :], axis=-1)
    x = jax.nn.softmax(logits, axis=-1)
    masks = jax.nn.softmax(x[:, None, :] + gumbels, axis=-1)
    return jnp.einsum("bts,bsf->btf", masks.astype(mxu_dtype), v_in,
                      preferred_element_type=f32)


# ------------------------------ deterministic parameter init ------------------------------
def init_selector_params(key, q_dim, dim):
    kq, kbq, kk, kbk = jax.random.split(key, 4)

    def lin(k, fan_in, shape):          # nn.Linear default: U(-1/sqrt(fan_in), 1/sqrt(fan_in))
        bound = 1.0 / math.sqrt(fan_in)
        return jax.random.uniform(k, shape, jnp.float32, -bound, bound)

    return {
        "wq": lin(kq, q_dim, (q_dim, dim)),       # stored (in, out): y = x @ W + b
        "bq": lin(kbq, q_dim, (1, dim)),
        "gq": jnp.ones((1, dim), jnp.float32),
        "betaq": jnp.zeros((1, dim), jnp.float32),
        "wk": lin(kk, dim, (dim, dim)),
        "bk": lin(kbk, dim, (1, dim)),
        "gk": jnp.ones((1, dim), jnp.float32),
        "betak": jnp.zeros((1, dim), jnp.float32),
    }


if __name__ == "__main__":
    root = jax.random.PRNGKey(0)
    kp, kq_, kv_, kg, kq2_, kv2_, kg2 = jax.random.split(root, 7)

    # ---------------- test 1: 3-D V, all-f32 MXU path, tight tolerance ----------------
    BS, N_SELECT, Q_DIM, DIM, TOPK = 2, 8, 64, 128, 4
    params = init_selector_params(kp, Q_DIM, DIM)
    Q = jax.random.normal(kq_, (BS, Q_DIM, 1), jnp.float32)            # question feature
    video = jax.random.normal(kv_, (BS, N_SELECT, DIM), jnp.float32)   # candidate segment feats
    K = video / jnp.linalg.norm(video, axis=-1, keepdims=True)         # normalized keys
    V = video

    fwd32 = jax.jit(partial(selector_forward, topk=TOPK, mxu_dtype=jnp.float32))
    out32 = jax.block_until_ready(fwd32(params, Q, K, V, kg))
    ref32 = selector_reference(params, Q, K, V, kg, TOPK, mxu_dtype=jnp.float32)
    assert out32.shape == (BS, TOPK, DIM), out32.shape
    assert bool(jnp.isfinite(out32).all())
    # Tolerance limited by softmax amplification of f32 reduction-order differences
    # (logits have std ~sqrt(dim)); still ~500x tighter than before.
    np.testing.assert_allclose(np.asarray(out32), np.asarray(ref32), rtol=1e-3, atol=2e-4)

    # ------- test 2: 5-D V, bf16 MXU path, batch grid (>1 step) + megacore semantics -------
    BS2, N_FRAME, OBJ_NUM, OBJ_DIM = 16, 2, 4, 32                      # feat = 256
    Q2 = jax.random.normal(kq2_, (BS2, Q_DIM, 1), jnp.float32)
    V2 = jax.random.normal(kv2_, (BS2, N_SELECT, N_FRAME, OBJ_NUM, OBJ_DIM), jnp.float32)
    K2 = jax.random.normal(kv2_, (BS2, N_SELECT, DIM), jnp.float32)
    K2 = K2 / jnp.linalg.norm(K2, axis=-1, keepdims=True)

    fwd16 = jax.jit(partial(selector_forward, topk=TOPK, mxu_dtype=jnp.bfloat16, bs_tile=8))
    out16 = jax.block_until_ready(fwd16(params, Q2, K2, V2, kg2))
    assert out16.shape == (BS2, TOPK * N_FRAME, OBJ_NUM, OBJ_DIM), out16.shape
    assert bool(jnp.isfinite(out16).all())
    ref16 = selector_reference(params, Q2, K2, V2, kg2, TOPK, mxu_dtype=jnp.bfloat16)
    ref16 = ref16.reshape(BS2, TOPK * N_FRAME, OBJ_NUM, OBJ_DIM)
    # bf16 path checked against a bf16-matched reference (f32 path above is the tight check).
    np.testing.assert_allclose(np.asarray(out16), np.asarray(ref16), rtol=5e-2, atol=5e-2)

    print("KERNEL_OK")
</pallas_src>

<mosaic_0001>
module attributes {stable_mosaic.version = 11 : i64} {
  func.func @_selector_kernel(%arg0: i32, %arg1: memref<2x64xf32, #tpu.memory_space<vmem>>, %arg2: memref<16x128xf32, #tpu.memory_space<vmem>>, %arg3: memref<2x8x128xf32, #tpu.memory_space<vmem>>, %arg4: memref<2x4x8xf32, #tpu.memory_space<vmem>>, %arg5: memref<64x128xf32, #tpu.memory_space<vmem>>, %arg6: memref<128x128xf32, #tpu.memory_space<vmem>>, %arg7: memref<8x128xf32, #tpu.memory_space<vmem>>, %arg8: memref<8x128xf32, #tpu.memory_space<vmem>>) attributes {dimension_semantics = [#tpu.dimension_semantics<parallel>], iteration_bounds = array<i64: 1>, scalar_prefetch = 0 : i64, scratch_operands = 0 : i64, tpu.core_type = #tpu.core_type<tc>, window_params = [{transform_indices = @transform_0, window_bounds = array<i64: 2, 64>}, {transform_indices = @transform_1, window_bounds = array<i64: 16, 128>}, {transform_indices = @transform_2, window_bounds = array<i64: 2, 8, 128>}, {transform_indices = @transform_3, window_bounds = array<i64: 2, 4, 8>}, {pipeline_mode = #tpu.pipeline_mode<synchronous>, transform_indices = @transform_4, window_bounds = array<i64: 64, 128>}, {pipeline_mode = #tpu.pipeline_mode<synchronous>, transform_indices = @transform_5, window_bounds = array<i64: 128, 128>}, {pipeline_mode = #tpu.pipeline_mode<synchronous>, transform_indices = @transform_6, window_bounds = array<i64: 8, 128>}, {transform_indices = @transform_7, window_bounds = array<i64: 8, 128>}]} {
    %c0 = arith.constant 0 : index
    %c0_0 = arith.constant 0 : index
    %0 = vector.load %arg7[%c0, %c0_0] : memref<8x128xf32, #tpu.memory_space<vmem>>, vector<1x128xf32>
    %c1 = arith.constant 1 : index
    %c0_1 = arith.constant 0 : index
    %1 = vector.load %arg7[%c1, %c0_1] : memref<8x128xf32, #tpu.memory_space<vmem>>, vector<1x128xf32>
    %c2 = arith.constant 2 : index
    %c0_2 = arith.constant 0 : index
    %2 = vector.load %arg7[%c2, %c0_2] : memref<8x128xf32, #tpu.memory_space<vmem>>, vector<1x128xf32>
    %c3 = arith.constant 3 : index
    %c0_3 = arith.constant 0 : index
    %3 = vector.load %arg7[%c3, %c0_3] : memref<8x128xf32, #tpu.memory_space<vmem>>, vector<1x128xf32>
    %c4 = arith.constant 4 : index
    %c0_4 = arith.constant 0 : index
    %4 = vector.load %arg7[%c4, %c0_4] : memref<8x128xf32, #tpu.memory_space<vmem>>, vector<1x128xf32>
    %c5 = arith.constant 5 : index
    %c0_5 = arith.constant 0 : index
    %5 = vector.load %arg7[%c5, %c0_5] : memref<8x128xf32, #tpu.memory_space<vmem>>, vector<1x128xf32>
    %c0_6 = arith.constant 0 : index
    %c0_7 = arith.constant 0 : index
    %6 = vector.load %arg1[%c0_6, %c0_7] : memref<2x64xf32, #tpu.memory_space<vmem>>, vector<2x64xf32>
    %c0_8 = arith.constant 0 : index
    %c0_9 = arith.constant 0 : index
    %7 = vector.load %arg5[%c0_8, %c0_9] : memref<64x128xf32, #tpu.memory_space<vmem>>, vector<64x128xf32>
    %cst = arith.constant dense<0.000000e+00> : vector<2x128xf32>
    %8 = tpu.matmul %6, %7, %cst {dimension_numbers = #tpu.dot_dimension_numbers<[1], [0], [0], [1], [0, 0, 1, 1], [], []>} : vector<2x64xf32>, vector<64x128xf32>, vector<2x128xf32> -> vector<2x128xf32>
    %9 = vector.broadcast %0 : vector<1x128xf32> to vector<2x128xf32>
    %10 = arith.addf %8, %9 : vector<2x128xf32>
    %cst_10 = arith.constant dense<0.000000e+00> : vector<2xf32>
    %11 = vector.multi_reduction <add>, %10, %cst_10 [1] : vector<2x128xf32> to vector<2xf32>
    %12 = vector.shape_cast %11 : vector<2xf32> to vector<2x1xf32>
    %cst_11 = arith.constant 1.280000e+02 : f32
    %13 = vector.broadcast %cst_11 : f32 to vector<2x1xf32>
    %14 = arith.divf %12, %13 : vector<2x1xf32>
    %15 = vector.broadcast %14 : vector<2x1xf32> to vector<2x128xf32>
    %16 = arith.subf %10, %15 : vector<2x128xf32>
    %17 = vector.broadcast %14 : vector<2x1xf32> to vector<2x128xf32>
    %18 = arith.subf %10, %17 : vector<2x128xf32>
    %19 = arith.mulf %16, %18 : vector<2x128xf32>
    %cst_12 = arith.constant dense<0.000000e+00> : vector<2xf32>
    %20 = vector.multi_reduction <add>, %19, %cst_12 [1] : vector<2x128xf32> to vector<2xf32>
    %21 = vector.shape_cast %20 : vector<2xf32> to vector<2x1xf32>
    %cst_13 = arith.constant 1.280000e+02 : f32
    %22 = vector.broadcast %cst_13 : f32 to vector<2x1xf32>
    %23 = arith.divf %21, %22 : vector<2x1xf32>
    %24 = vector.broadcast %14 : vector<2x1xf32> to vector<2x128xf32>
    %25 = arith.subf %10, %24 : vector<2x128xf32>
    %cst_14 = arith.constant 9.99999996E-13 : f32
    %26 = vector.broadcast %cst_14 : f32 to vector<2x1xf32>
    %27 = arith.addf %23, %26 : vector<2x1xf32>
    %28 = math.rsqrt %27 : vector<2x1xf32>
    %29 = vector.broadcast %28 : vector<2x1xf32> to vector<2x128xf32>
    %30 = arith.mulf %25, %29 : vector<2x128xf32>
    %31 = vector.broadcast %1 : vector<1x128xf32> to vector<2x128xf32>
    %32 = arith.mulf %30, %31 : vector<2x128xf32>
    %33 = vector.broadcast %2 : vector<1x128xf32> to vector<2x128xf32>
    %34 = arith.addf %32, %33 : vector<2x128xf32>
    %c0_15 = arith.constant 0 : index
    %c0_16 = arith.constant 0 : index
    %35 = vector.load %arg2[%c0_15, %c0_16] : memref<16x128xf32, #tpu.memory_space<vmem>>, vector<16x128xf32>
    %c0_17 = arith.constant 0 : index
    %c0_18 = arith.constant 0 : index
    %36 = vector.load %arg6[%c0_17, %c0_18] : memref<128x128xf32, #tpu.memory_space<vmem>>, vector<128x128xf32>
    %cst_19 = arith.constant dense<0.000000e+00> : vector<16x128xf32>
    %37 = tpu.matmul %35, %36, %cst_19 {dimension_numbers = #tpu.dot_dimension_numbers<[1], [0], [0], [1], [0, 0, 1, 1], [], []>} : vector<16x128xf32>, vector<128x128xf32>, vector<16x128xf32> -> vector<16x128xf32>
    %38 = vector.broadcast %3 : vector<1x128xf32> to vector<16x128xf32>
    %39 = arith.addf %37, %38 : vector<16x128xf32>
    %cst_20 = arith.constant dense<0.000000e+00> : vector<16xf32>
    %40 = vector.multi_reduction <add>, %39, %cst_20 [1] : vector<16x128xf32> to vector<16xf32>
    %41 = vector.shape_cast %40 : vector<16xf32> to vector<16x1xf32>
    %cst_21 = arith.constant 1.280000e+02 : f32
    %42 = vector.broadcast %cst_21 : f32 to vector<16x1xf32>
    %43 = arith.divf %41, %42 : vector<16x1xf32>
    %44 = vector.broadcast %43 : vector<16x1xf32> to vector<16x128xf32>
    %45 = arith.subf %39, %44 : vector<16x128xf32>
    %46 = vector.broadcast %43 : vector<16x1xf32> to vector<16x128xf32>
    %47 = arith.subf %39, %46 : vector<16x128xf32>
    %48 = arith.mulf %45, %47 : vector<16x128xf32>
    %cst_22 = arith.constant dense<0.000000e+00> : vector<16xf32>
    %49 = vector.multi_reduction <add>, %48, %cst_22 [1] : vector<16x128xf32> to vector<16xf32>
    %50 = vector.shape_cast %49 : vector<16xf32> to vector<16x1xf32>
    %cst_23 = arith.constant 1.280000e+02 : f32
    %51 = vector.broadcast %cst_23 : f32 to vector<16x1xf32>
    %52 = arith.divf %50, %51 : vector<16x1xf32>
    %53 = vector.broadcast %43 : vector<16x1xf32> to vector<16x128xf32>
    %54 = arith.subf %39, %53 : vector<16x128xf32>
    %cst_24 = arith.constant 9.99999996E-13 : f32
    %55 = vector.broadcast %cst_24 : f32 to vector<16x1xf32>
    %56 = arith.addf %52, %55 : vector<16x1xf32>
    %57 = math.rsqrt %56 : vector<16x1xf32>
    %58 = vector.broadcast %57 : vector<16x1xf32> to vector<16x128xf32>
    %59 = arith.mulf %54, %58 : vector<16x128xf32>
    %60 = vector.broadcast %4 : vector<1x128xf32> to vector<16x128xf32>
    %61 = arith.mulf %59, %60 : vector<16x128xf32>
    %62 = vector.broadcast %5 : vector<1x128xf32> to vector<16x128xf32>
    %63 = arith.addf %61, %62 : vector<16x128xf32>
    %64 = vector.shape_cast %63 : vector<16x128xf32> to vector<2x8x128xf32>
    %65 = vector.shape_cast %34 : vector<2x128xf32> to vector<2x1x128xf32>
    %66 = vector.broadcast %65 : vector<2x1x128xf32> to vector<2x8x128xf32>
    %67 = arith.mulf %64, %66 : vector<2x8x128xf32>
    %cst_25 = arith.constant dense<0.000000e+00> : vector<2x8xf32>
    %68 = vector.multi_reduction <add>, %67, %cst_25 [2] : vector<2x8x128xf32> to vector<2x8xf32>
    %cst_26 = arith.constant dense<0xFF800000> : vector<2xf32>
    %69 = vector.multi_reduction <maximumf>, %68, %cst_26 [1] : vector<2x8xf32> to vector<2xf32>
    %70 = vector.shape_cast %69 : vector<2xf32> to vector<2x1xf32>
    %71 = vector.broadcast %70 : vector<2x1xf32> to vector<2x8xf32>
    %72 = arith.subf %68, %71 : vector<2x8xf32>
    %73 = math.exp %72 : vector<2x8xf32>
    %cst_27 = arith.constant dense<0.000000e+00> : vector<2xf32>
    %74 = vector.multi_reduction <add>, %73, %cst_27 [1] : vector<2x8xf32> to vector<2xf32>
    %75 = vector.shape_cast %74 : vector<2xf32> to vector<2x1xf32>
    %76 = vector.broadcast %75 : vector<2x1xf32> to vector<2x8xf32>
    %77 = arith.divf %73, %76 : vector<2x8xf32>
    %78 = vector.shape_cast %77 : vector<2x8xf32> to vector<2x1x8xf32>
    %c0_28 = arith.constant 0 : index
    %c0_29 = arith.constant 0 : index
    %c0_30 = arith.constant 0 : index
    %79 = vector.load %arg4[%c0_28, %c0_29, %c0_30] : memref<2x4x8xf32, #tpu.memory_space<vmem>>, vector<2x4x8xf32>
    %80 = vector.broadcast %78 : vector<2x1x8xf32> to vector<2x4x8xf32>
    %81 = arith.addf %80, %79 : vector<2x4x8xf32>
    %cst_31 = arith.constant dense<0xFF800000> : vector<2x4xf32>
    %82 = vector.multi_reduction <maximumf>, %81, %cst_31 [2] : vector<2x4x8xf32> to vector<2x4xf32>
    %83 = vector.shape_cast %82 : vector<2x4xf32> to vector<2x4x1xf32>
    %84 = vector.broadcast %83 : vector<2x4x1xf32> to vector<2x4x8xf32>
    %85 = arith.subf %81, %84 : vector<2x4x8xf32>
    %86 = math.exp %85 : vector<2x4x8xf32>
    %cst_32 = arith.constant dense<0.000000e+00> : vector<2x4xf32>
    %87 = vector.multi_reduction <add>, %86, %cst_32 [2] : vector<2x4x8xf32> to vector<2x4xf32>
    %88 = vector.shape_cast %87 : vector<2x4xf32> to vector<2x4x1xf32>
    %89 = vector.broadcast %88 : vector<2x4x1xf32> to vector<2x4x8xf32>
    %90 = arith.divf %86, %89 : vector<2x4x8xf32>
    %c0_33 = arith.constant 0 : index
    %c0_34 = arith.constant 0 : index
    %c0_35 = arith.constant 0 : index
    %91 = vector.load %arg3[%c0_33, %c0_34, %c0_35] : memref<2x8x128xf32, #tpu.memory_space<vmem>>, vector<2x8x128xf32>
    "tpu.trace_start"() <{level = 10 : i32, message = "bts,bsf->btf"}> : () -> ()
    %cst_36 = arith.constant dense<0.000000e+00> : vector<2x4x128xf32>
    %92 = tpu.matmul %90, %91, %cst_36 {dimension_numbers = #tpu.dot_dimension_numbers<[2], [1], [1], [2], [0, 0, 0, 1, 1, 2], [0], [0]>} : vector<2x4x8xf32>, vector<2x8x128xf32>, vector<2x4x128xf32> -> vector<2x4x128xf32>
    "tpu.trace_stop"() : () -> ()
    %93 = vector.shape_cast %92 : vector<2x4x128xf32> to vector<8x128xf32>
    %c0_37 = arith.constant 0 : index
    %c0_38 = arith.constant 0 : index
    %94 = vector.load %arg8[%c0_37, %c0_38] : memref<8x128xf32, #tpu.memory_space<vmem>>, vector<8x128xf32>
    tpu.vector_store %arg8[%c0_37, %c0_38], %93 {strides = array<i32>} : memref<8x128xf32, #tpu.memory_space<vmem>>, vector<8x128xf32>,
    return
  }
  func.func @transform_0(%arg0: i32) -> (i32, i32) {
    %c0_i32 = arith.constant 0 : i32
    %c0_i32_0 = arith.constant 0 : i32
    return %arg0, %c0_i32 : i32, i32
  }
  func.func @transform_1(%arg0: i32) -> (i32, i32) {
    %c0_i32 = arith.constant 0 : i32
    %c0_i32_0 = arith.constant 0 : i32
    return %arg0, %c0_i32 : i32, i32
  }
  func.func @transform_2(%arg0: i32) -> (i32, i32, i32) {
    %c0_i32 = arith.constant 0 : i32
    %c0_i32_0 = arith.constant 0 : i32
    %c0_i32_1 = arith.constant 0 : i32
    return %arg0, %c0_i32, %c0_i32_0 : i32, i32, i32
  }
  func.func @transform_3(%arg0: i32) -> (i32, i32, i32) {
    %c0_i32 = arith.constant 0 : i32
    %c0_i32_0 = arith.constant 0 : i32
    %c0_i32_1 = arith.constant 0 : i32
    return %arg0, %c0_i32, %c0_i32_0 : i32, i32, i32
  }
  func.func @transform_4(%arg0: i32) -> (i32, i32) {
    %c0_i32 = arith.constant 0 : i32
    %c0_i32_0 = arith.constant 0 : i32
    %c0_i32_1 = arith.constant 0 : i32
    return %c0_i32, %c0_i32_0 : i32, i32
  }
  func.func @transform_5(%arg0: i32) -> (i32, i32) {
    %c0_i32 = arith.constant 0 : i32
    %c0_i32_0 = arith.constant 0 : i32
    %c0_i32_1 = arith.constant 0 : i32
    return %c0_i32, %c0_i32_0 : i32, i32
  }
  func.func @transform_6(%arg0: i32) -> (i32, i32) {
    %c0_i32 = arith.constant 0 : i32
    %c0_i32_0 = arith.constant 0 : i32
    %c0_i32_1 = arith.constant 0 : i32
    return %c0_i32, %c0_i32_0 : i32, i32
  }
  func.func @transform_7(%arg0: i32) -> (i32, i32) {
    %c0_i32 = arith.constant 0 : i32
    %c0_i32_0 = arith.constant 0 : i32
    return %arg0, %c0_i32 : i32, i32
  }
}

</mosaic_0001>

<bundles_post_ra>
// kernel: selector_forward.1
= control target key start
LH: loop header
LB: loop body
LE: loop exit
PB: predicated region body
PF: predicated region fallthrough
CT: control target
= control target key end

     0   :  { %12 = vsyncpa [#allocation3], 0  ;;  %s1540_s0 = inlined_call_operand.vmem [shape: f32[2,64], index: 0, kind: input, shape index: {}]   ;;  %s1541_s1 = inlined_call_operand.hbm [shape: f32[16,128], index: 1, kind: input, shape index: {}]   ;;  %s1542_s2 = inlined_call_operand.hbm [shape: f32[2,8,128], index: 2, kind: input, shape index: {}]   ;;  %s1543_s3 = inlined_call_operand.vmem [shape: f32[2,4,8], index: 3, kind: input, shape index: {}]   ;;  %s1544_s4 = inlined_call_operand.vmem [shape: f32[64,128], index: 4, kind: input, shape index: {}]   ;;  %s1545_s5 = inlined_call_operand.hbm [shape: f32[128,128], index: 5, kind: input, shape index: {}]   ;;  %s1546_s6 = inlined_call_operand.vmem [shape: f32[8,128], index: 6, kind: input, shape index: {}]   ;;  %s1547_s7 = inlined_call_operand.hbm [shape: f32[8,128], index: 7, kind: output, shape index: {}]  }
   0x1   :  { %13 = vsyncpa [#allocation6], 0 }
   0x2   :  { %14 = vsyncpa [#allocation4], 0  ;;  %s1273_s24 = smov [#allocation5]   ;;  %s1274_s26 = smov [#allocation2]  }
   0x3   :  { %s34_s25 = sshll.u32 %s1273_s24, 4  ;;  %s22_s27 = sshll.u32 %s1274_s26, 4  ;;  %s35_s25 = int_to_ptr.vmem [resolvable:$true] %s34_s25  ;;  %s23_s27 = int_to_ptr.vmem [resolvable:$true] %s22_s27 }
   0x4   :  { %s1195_s28 = scalar_lea.vmem %s35_s25, 256  ;;  %p1200_p1 = scmp.lt.s32.totalorder %s35_s25, %s35_s25 }
   0x5   :  { %p1196_p0 = scmp.ne.s32.totalorder %s35_s25, %s1195_s28  ;;  %p1201_p2 = scmp.lt.s32.totalorder %s1195_s28, %s1195_s28 }
   0x7   :  { %p1202_p3 = por %p1201_p2, %p1200_p1 }
   0x9   :  { %p1203_p4 = pnand %p1202_p3, %p1196_p0 }
   0xb   :  { %1206 = shalt.err (!%p1203_p4)
}
   0xc   :  { %s1275_s29 = smov 128   ;;  %s1276_s30 = smov 8  }
   0xd   :  { %40 = dma.hbm_to_vmem [thread:$0]  %s1542_s2, 256, %s35_s25, [#allocation6], %s1275_s29, %s1275_s29, %s1276_s30  }
   0xe   :  { %s1215_s10 = scalar_lea.vmem %s23_s27, 256  ;;  %p1220_p6 = scmp.lt.s32.totalorder %s23_s27, %s23_s27 }
   0xf   :  { %p1216_p5 = scmp.ne.s32.totalorder %s23_s27, %s1215_s10  ;;  %p1221_p7 = scmp.lt.s32.totalorder %s1215_s10, %s1215_s10 }
  0x11   :  { %p1222_p8 = por %p1221_p7, %p1220_p6 }
  0x13   :  { %p1223_p9 = pnand %p1222_p8, %p1216_p5 }
  0x15   :  { %1226 = shalt.err (!%p1223_p9)
}
  0x16   :  { %28 = dma.hbm_to_vmem [thread:$0]  %s1541_s1, 256, %s23_s27, [#allocation3], %s1275_s29, %s1275_s29, %s1276_s30  }
  0x17   :  { %s1277_s13 = smov [#allocation7]  }
  0x18   :  { %s50_s14 = sshll.u32 %s1277_s13, 4  ;;  %s51_s14 = int_to_ptr.vmem [resolvable:$true] %s50_s14 }
  0x19   :  { %s1235_s15 = scalar_lea.vmem %s51_s14, 2048  ;;  %p1240_p11 = scmp.lt.s32.totalorder %s51_s14, %s51_s14 }
  0x1a   :  { %p1236_p10 = scmp.ne.s32.totalorder %s51_s14, %s1235_s15  ;;  %p1241_p12 = scmp.lt.s32.totalorder %s1235_s15, %s1235_s15 }
  0x1c   :  { %p1242_p13 = por %p1241_p12, %p1240_p11 }
  0x1e   :  { %p1243_p0 = pnand %p1242_p13, %p1236_p10 }
  0x20   :  { %1246 = shalt.err (!%p1243_p0)
}
  0x21   :  { %56 = dma.hbm_to_vmem [thread:$0]  %s1545_s5, 2048, %s51_s14, [#allocation6], %s1275_s29, %s1275_s29, %s1276_s30  }
  0x22   :  { %1267 = dma.done.wait [#allocation3], 256  }
  0x23   :  { %1268 = vsyncadd [#allocation3], 4294967040 }
  0x24   :  { %1269 = dma.done.wait [#allocation6], 2304  }
  0x25   :  { %1270 = vsyncadd [#allocation6], 4294964992  ;;  %v1278_v0 = vmov 0.0   ;;  %vm1279_vm0 = vmmov 0   ;;  %v82_v1 = vld [vmem:[%s1544_s4 + $0x38] sm:$0xff]  ;;  %v81_v3 = vld [vmem:[%s1544_s4 + $0x30] sm:$0xff]  ;;  %v321_v56 = vlaneseq }
  0x26   :  { %1065 = vmatprep.subr.mxu0 %v1278_v0  ;;  %1081 = vmatprep.mubr.msk.f32.mxu0 %vm1279_vm0, %v1278_v0  ;;  %v203_v2 = vld [vmem:[#allocation7 + $0x78] sm:$0xff]  ;;  %v202_v4 = vld [vmem:[#allocation7 + $0x70] sm:$0xff]  ;;  %v80_v5 = vld [vmem:[%s1544_s4 + $0x28] sm:$0xff]  ;;  %vm87_vm1 = vcmask 523264   ;;  %vm161_vm2 = vcmask 1041408   ;;  %vm368_vm3 = vcmask 1041409  }
  0x27   :  { %1066 = vmatpush3.msra.mxu0 %v82_v1  ;;  %1084 = vmatprep.subr.mxu1 %v203_v2  ;;  %v201_v6 = vld [vmem:[#allocation7 + $0x68] sm:$0xff]  ;;  %v79_v7 = vld [vmem:[%s1544_s4 + $0x20] sm:$0xff]  ;;  %v78_v9 = vld [vmem:[%s1544_s4 + $0x18] sm:$0xff]  ;;  %v1280_v54 = vmov 1966171168   ;;  %vm371_vm4 = vcmask 58368  }
  0x28   :  { %1067 = vmatprep.subr.mxu0 %v1278_v0  ;;  %1085 = vmatpush3.msra.mxu1 %v203_v2  ;;  %v200_v8 = vld [vmem:[#allocation7 + $0x60] sm:$0xff]  ;;  %v199_v10 = vld [vmem:[#allocation7 + $0x58] sm:$0xff]  ;;  %v77_v11 = vld [vmem:[%s1544_s4 + $0x10] sm:$0xff]  ;;  %v319_v55 = vunpack.c.l.s4 %v1280_v54  ;;  %v1383_v2 = vshrl.u32 %v321_v56, 7  ;;  %vm569_vm5 = vcmask 1042434   ;;  %vm571_vm6 = vcmask 1043459  }
  0x29   :  { %1068 = vmatpush3.msra.mxu0 %v81_v3  ;;  %1086 = vmatprep.subr.mxu1 %v202_v4  ;;  %v198_v12 = vld [vmem:[#allocation7 + $0x50] sm:$0xff]  ;;  %v76_v13 = vld [vmem:[%s1544_s4 + $0x8] sm:$0xff]  ;;  %v75_v15 = vld [vmem:[%s1544_s4] sm:$0xff]  ;;  %vm578_vm7 = vcmask 60416   ;;  %vm824_vm8 = vcmask 64512  }
  0x2a   :  { %1069 = vmatprep.subr.mxu0 %v1278_v0  ;;  %1087 = vmatpush3.msra.mxu1 %v202_v4  ;;  %v197_v14 = vld [vmem:[#allocation7 + $0x48] sm:$0xff]  ;;  %v196_v16 = vld [vmem:[#allocation7 + $0x40] sm:$0xff]  ;;  %v195_v18 = vld [vmem:[#allocation7 + $0x38] sm:$0xff]  ;;  %v320_v1 = vunpack.c.0.s8 %v319_v55 }
  0x2b   :  { %1070 = vmatpush3.msra.mxu0 %v80_v5  ;;  %1088 = vmatprep.subr.mxu1 %v201_v6  ;;  %v74_v17 = vld [vmem:[%s1540_s0] sm:$0x3]  ;;  %v194_v20 = vld [vmem:[#allocation7 + $0x30] sm:$0xff]  ;;  %v193_v21 = vld [vmem:[#allocation7 + $0x28] sm:$0xff] }
  0x2c   :  { %1071 = vmatprep.subr.mxu0 %v1278_v0  ;;  %1089 = vmatpush3.msra.mxu1 %v201_v6  ;;  %v186_v19 = vld [vmem:[#allocation2] sm:$0xff]  ;;  %v191_v23 = vld [vmem:[#allocation7 + $0x18] sm:$0xff]  ;;  %v190_v24 = vld [vmem:[#allocation7 + $0x10] sm:$0xff] }
  0x2d   :  { %1072 = vmatpush3.msra.mxu0 %v79_v7  ;;  %1090 = vmatprep.subr.mxu1 %v200_v8  ;;  %v192_v22 = vld [vmem:[#allocation7 + $0x20] sm:$0xff]  ;;  %v189_v25 = vld [vmem:[#allocation7 + $0x8] sm:$0xff]  ;;  %v323_v7 = vsub.s32 %v320_v1, %v1383_v2 }
  0x2e   :  { %1073 = vmatprep.subr.mxu0 %v1278_v0  ;;  %1091 = vmatpush3.msra.mxu1 %v200_v8  ;;  %v188_v26 = vld [vmem:[#allocation7] sm:$0xff]  ;;  %v187_v27 = vld [vmem:[#allocation2 + $0x8] sm:$0xff] }
  0x2f   :  { %1074 = vmatpush3.msra.mxu0 %v78_v9  ;;  %1092 = vmatprep.subr.mxu1 %v199_v10  ;;  %v1025_v28 = vld [vmem:[%s1546_s6] ss:$0 sm:$0xff]  ;;  %v1029_v33 = vld [vmem:[%s1546_s6 + $0x3] ss:$0 sm:$0xff]  ;;  %v1027_v63 = vld [vmem:[%s1546_s6 + $0x1] ss:$0 sm:$0xff] }
  0x30   :  { %1075 = vmatprep.subr.mxu0 %v1278_v0  ;;  %1093 = vmatpush3.msra.mxu1 %v199_v10  ;;  %v1028_v5 = vld [vmem:[%s1546_s6 + $0x2] ss:$0 sm:$0xff]  ;;  %v429_v54 = vld [vmem:[%s1543_s3 + $0x4] sm:$0xf] }
  0x31   :  { %1076 = vmatpush3.msra.mxu0 %v77_v11  ;;  %1094 = vmatprep.subr.mxu1 %v198_v12 }
  0x32   :  { %1077 = vmatprep.subr.mxu0 %v1278_v0  ;;  %1095 = vmatpush3.msra.mxu1 %v198_v12  ;;  %v1030_v12 = vld [vmem:[%s1546_s6 + $0x4] ss:$0 sm:$0xff] }
  0x33   :  { %1078 = vmatpush3.msra.mxu0 %v76_v13  ;;  %1096 = vmatprep.subr.mxu1 %v197_v14 }
  0x34   :  { %1079 = vmatprep.subr.mxu0 %v1278_v0  ;;  %1097 = vmatpush3.msra.mxu1 %v197_v14 }
  0x35   :  { %1080 = vmatpush3.msra.mxu0 %v75_v15  ;;  %1098 = vmatprep.subr.mxu1 %v196_v16 }
  0x36   :  { %1082 = vmatmul.mubr.msk.f32.vlgmr.msra.gmra.mxu0 %vm87_vm1, %v74_v17  ;;  %1099 = vmatpush3.msra.mxu1 %v196_v16  ;;  %v1031_v16 = vld [vmem:[%s1546_s6 + $0x5] ss:$0 sm:$0xff] }
  0x37   :  { %1100 = vmatprep.subr.mxu1 %v195_v18  ;;  %1116 = vmatprep.mubr.f32.mxu1 %v186_v19 }
  0x38   :  { %1101 = vmatpush3.msra.mxu1 %v195_v18  ;;  %1119 = vmatprep.subr.mxu0 %v1278_v0  ;;  %v1396_v18 = vsub.s32 0, %v1383_v2 }
  0x39   :  { %1102 = vmatprep.subr.mxu1 %v194_v20  ;;  %1121 = vmatprep.mubr.msk.f32.mxu0 %vm1279_vm0, %v1278_v0 }
  0x3a   :  { %1103 = vmatpush3.msra.mxu1 %v194_v20  ;;  %v463_v55 = vrot.slane %v429_v54, %v1396_v18 }
  0x3b   :  { %1104 = vmatprep.subr.mxu1 %v193_v21 }
  0x3c   :  { %1105 = vmatpush3.msra.mxu1 %v193_v21 }
  0x3d   :  { %1106 = vmatprep.subr.mxu1 %v192_v22 }
  0x3e   :  { %1107 = vmatpush3.msra.mxu1 %v192_v22 }
  0x3f   :  { %1108 = vmatprep.subr.mxu1 %v191_v23 }
  0x40   :  { %1109 = vmatpush3.msra.mxu1 %v191_v23 }
  0x41   :  { %1110 = vmatprep.subr.mxu1 %v190_v24 }
  0x42   :  { %1111 = vmatpush3.msra.mxu1 %v190_v24 }
  0x43   :  { %1112 = vmatprep.subr.mxu1 %v189_v25 }
  0x44   :  { %1113 = vmatpush3.msra.mxu1 %v189_v25 }
  0x45   :  { %1114 = vmatprep.subr.mxu1 %v188_v26 }
  0x46   :  { %1115 = vmatpush3.msra.mxu1 %v188_v26 }
  0x47   :  { %1117 = vmatmul.mubr.f32.vlgmr.msra.gmra.mxu1 %v187_v27 }
  0xf6   :  { %v157_v29 = vpop.f32.mrf.mxu0 }
  0xf7   :  { %v158_v30 = vadd.f32 %v1025_v28, %v157_v29  ;;  %v359_v28 = vand.u32 127, %v321_v56 }
  0xf8   :  { %v1083_v31 = vpop.f32.mrf.mxu0 }
  0xf9   :  { %v162_v32 = vsel %vm161_vm2, %v158_v30, 0.0  ;;  %v1401_v29 = vsub.s32 %v359_v28, %v1383_v2 }
  0xfa   :  { %163 = vadd.xlane.f32.xlu0 %v162_v32 }
 0x107   :  { %v1118_v34 = vpop.f32.mrf.mxu1 }
 0x108   :  { %v280_v35 = vadd.f32 %v1118_v34, %v1029_v33 }
 0x109   :  { %v274_v36 = vpop.f32.mrf.mxu1 }
 0x10a   :  { %v275_v37 = vadd.f32 %v1029_v33, %v274_v36  ;;  %285 = vadd.xlane.f32.xlu1 %v280_v35  ;;  %v1281_v36 = vmov 0  }
 0x10b   :  { %1140 = vset.pattern.permute.xlu0 %v1281_v36  ;;  %1139 = vset.pattern.permute.xlu1 %v1281_v36 }
 0x10c   :  { %283 = vadd.xlane.f32.xlu0 %v275_v37 }
 0x183   :  { %v164_v38 = vpop.xlane.xlu0 %163 }
 0x184   :  { %v166_v39 = vmul.f32 0.0078125, %v164_v38 }
 0x186   :  { %v167_v40 = vsub.f32 %v158_v30, %v166_v39 }
 0x188   :  { %v168_v41 = vmul.f32 %v167_v40, %v167_v40 }
 0x18a   :  { %v169_v42 = vsel %vm161_vm2, %v168_v41, 0.0 }
 0x18b   :  { %170 = vadd.xlane.f32.xlu1 %v169_v42 }
 0x193   :  { %v286_v43 = vpop.xlane.xlu1 %285 }
 0x194   :  { %v288_v44 = vmul.f32 0.0078125, %v286_v43 }
 0x195   :  { %v284_v45 = vpop.xlane.xlu0 %283 }
 0x196   :  { %v290_v46 = vsub.f32 %v280_v35, %v288_v44  ;;  %v287_v47 = vmul.f32 0.0078125, %v284_v45  ;;  %v1413_v45 = vsub.s32 2, %v1383_v2 }
 0x198   :  { %v289_v48 = vsub.f32 %v275_v37, %v287_v47  ;;  %v292_v49 = vmul.f32 %v290_v46, %v290_v46  ;;  %v1408_v37 = vsub.s32 1, %v1383_v2 }
 0x19a   :  { %295 = vadd.xlane.f32.xlu1 %v292_v49  ;;  %v291_v50 = vmul.f32 %v289_v48, %v289_v48  ;;  %v470_v56 = vrot.slane %v429_v54, %v1408_v37 }
 0x19c   :  { %293 = vadd.xlane.f32.xlu0 %v291_v50 }
 0x214   :  { %v171_v51 = vpop.xlane.xlu1 %170 }
 0x215   :  { %v172_v52 = vmul.f32 0.0078125, %v171_v51 }
 0x217   :  { %v173_v53 = vadd.f32 1e-12, %v172_v52  ;;  %v1422_v52 = vsub.s32 3, %v1383_v2 }
 0x219   :  { %1141 = vrsqrt.f32 %v173_v53  ;;  %v484_v1 = vrot.slane %v429_v54, %v1422_v52 }
 0x223   :  { %v296_v57 = vpop.xlane.xlu1 %295 }
 0x224   :  { %v298_v58 = vmul.f32 0.0078125, %v296_v57  ;;  %v477_v57 = vrot.slane %v429_v54, %v1413_v45 }
 0x225   :  { %v294_v59 = vpop.xlane.xlu0 %293 }
 0x226   :  { %v1142_v60 = vpop.eup %1141  ;;  %v300_v61 = vadd.f32 1e-12, %v298_v58  ;;  %v297_v62 = vmul.f32 0.0078125, %v294_v59 }
 0x227   :  { %v175_v3 = vmul.f32 %v1142_v60, %v167_v40 }
 0x228   :  { %1143 = vrsqrt.f32 %v300_v61  ;;  %v299_v4 = vadd.f32 1e-12, %v297_v62 }
 0x229   :  { %v180_v6 = vmul.f32 %v1027_v63, %v175_v3 }
 0x22a   :  { %1145 = vrsqrt.f32 %v299_v4 }
 0x22b   :  { %v185_v8 = vadd.f32 %v1028_v5, %v180_v6 }
 0x22d   :  { %v324_v9 = vrot.slane %v185_v8, %v323_v7 }
 0x22f   :  { %v325_v10 = vcombine.high %v324_v9, %v324_v9  ;;  %v332_v20 = vrot.slane %v324_v9, %v323_v7 }
 0x231   :  { %v339_v14 = vrot.slane %v325_v10, %v323_v7  ;;  %v343_v26 = vrot.slane %v332_v20, %v1396_v18 }
 0x233   :  { %v347_v22 = vrot.slane %v339_v14, %v1396_v18 }
 0x235   :  { %v1144_v11 = vpop.eup %1143 }
 0x236   :  { %v304_v13 = vmul.f32 %v1144_v11, %v290_v46  ;;  %v428_v46 = vld [vmem:[%s1543_s3] sm:$0xf]  ;;  %s1282_s3 = smov [#allocation8]  }
 0x237   :  { %v1146_v15 = vpop.eup %1145  ;;  %v449_v49 = vrot.slane %v428_v46, %v1413_v45  ;;  %v435_v50 = vrot.slane %v428_v46, %v1396_v18  ;;  %v442_v51 = vrot.slane %v428_v46, %v1408_v37  ;;  %v456_v53 = vrot.slane %v428_v46, %v1422_v52  ;;  %s1015_s20 = sshll.u32 %s1282_s3, 4  ;;  %s1016_s20 = int_to_ptr.vmem [resolvable:$true] %s1015_s20 }
 0x238   :  { %v310_v17 = vmul.f32 %v1030_v12, %v304_v13  ;;  %v303_v19 = vmul.f32 %v1146_v15, %v289_v48  ;;  %s1247_s21 = scalar_lea.vmem %s1016_s20, 128  ;;  %p1252_p2 = scmp.lt.s32.totalorder %s1016_s20, %s1016_s20 }
 0x239   :  { %p1248_p1 = scmp.ne.s32.totalorder %s1016_s20, %s1247_s21  ;;  %p1253_p3 = scmp.lt.s32.totalorder %s1247_s21, %s1247_s21 }
 0x23a   :  { %v316_v21 = vadd.f32 %v1031_v16, %v310_v17  ;;  %v309_v23 = vmul.f32 %v1030_v12, %v303_v19 }
 0x23b   :  { %p1254_p4 = por %p1253_p3, %p1252_p2 }
 0x23c   :  { %v351_v24 = vmul.f32 %v347_v22, %v316_v21  ;;  %v315_v25 = vadd.f32 %v1031_v16, %v309_v23 }
 0x23d   :  { %p1255_p5 = pnand %p1254_p4, %p1248_p1 }
 0x23e   :  { %354 = vadd.xlane.f32.xlu1 %v351_v24  ;;  %v350_v27 = vmul.f32 %v343_v26, %v315_v25 }
 0x240   :  { %352 = vadd.xlane.f32.xlu0 %v350_v27 }
 0x2c7   :  { %v355_v30 = vpop.xlane.xlu1 %354 }
 0x2c8   :  { %v367_v32 = vrot.slane %v355_v30, %v1401_v29 }
 0x2c9   :  { %v353_v31 = vpop.xlane.xlu0 %352 }
 0x2ca   :  { %v363_v33 = vrot.slane %v353_v31, %v1401_v29 }
 0x2cc   :  { %v369_v34 = vsel %vm368_vm3, %v367_v32, %v363_v33 }
 0x2cd   :  { %v372_v35 = vsel %vm371_vm4, %v369_v34, -inf }
 0x2ce   :  { %373 = vmax.xlane.f32.xlu0 %v372_v35 }
 0x357   :  { %v374_v38 = vpop.xlane.xlu0 %373 }
 0x358   :  { %v379_v39 = vrot.slane %v374_v38, %v1396_v18  ;;  %v383_v40 = vrot.slane %v374_v38, %v1408_v37 }
 0x35a   :  { %v386_v41 = vsub.f32 %v353_v31, %v379_v39  ;;  %v387_v42 = vsub.f32 %v355_v30, %v383_v40 }
 0x35c   :  { %v388_v43 = vmul.f32 1.442695, %v386_v41  ;;  %v390_v44 = vmul.f32 1.442695, %v387_v42 }
 0x35e   :  { %1147 = vpow2.f32 %v388_v43 }
 0x35f   :  { %1149 = vpow2.f32 %v390_v44 }
 0x36b   :  { %v1148_v47 = vpop.eup %1147 }
 0x36c   :  { %v1150_v48 = vpop.eup %1149  ;;  %395 = vperm.xlu1 %1139, %v1148_v47  }
 0x36d   :  { %398 = vperm.xlu0 %1140, %v1150_v48  }
 0x370   :  { %451 = vbcast.lane.b32.xlu1 %v449_v49, 256 }
 0x371   :  { %437 = vbcast.lane.b32.xlu0 %v435_v50, 256 }
 0x375   :  { %444 = vbcast.lane.b32.xlu0 %v442_v51, 256 }
 0x379   :  { %458 = vbcast.lane.b32.xlu0 %v456_v53, 256 }
 0x37d   :  { %465 = vbcast.lane.b32.xlu0 %v463_v55, 256 }
 0x381   :  { %472 = vbcast.lane.b32.xlu0 %v470_v56, 256 }
 0x385   :  { %479 = vbcast.lane.b32.xlu0 %v477_v57, 256 }
 0x3e7   :  { %v396_v58 = vpop.permute.xlu1 %395 }
 0x3e8   :  { %v399_v59 = vpop.permute.xlu0 %398  ;;  %v403_v60 = vrot.slane %v396_v58, %v1401_v29 }
 0x3e9   :  { %v407_v61 = vrot.slane %v399_v59, %v1401_v29 }
 0x3eb   :  { %v408_v62 = vsel %vm368_vm3, %v407_v61, %v403_v60  ;;  %v452_v2 = vpop.permute.xlu1 %451 }
 0x3ec   :  { %v410_v63 = vsel %vm371_vm4, %v408_v62, 0.0  ;;  %v438_v3 = vpop.permute.xlu0 %437 }
 0x3ed   :  { %411 = vadd.xlane.f32.xlu1 %v410_v63 }
 0x3f0   :  { %v445_v7 = vpop.permute.xlu0 %444 }
 0x3f4   :  { %v459_v8 = vpop.permute.xlu0 %458 }
 0x3f8   :  { %v466_v10 = vpop.permute.xlu0 %465 }
 0x3fc   :  { %v473_v15 = vpop.permute.xlu0 %472 }
 0x3fe   :  { %486 = vbcast.lane.b32.xlu1 %v484_v1, 256 }
 0x400   :  { %v480_v22 = vpop.permute.xlu0 %479 }
 0x476   :  { %v412_v4 = vpop.xlane.xlu1 %411 }
 0x477   :  { %v417_v5 = vrot.slane %v412_v4, %v1396_v18  ;;  %v421_v6 = vrot.slane %v412_v4, %v1408_v37 }
 0x479   :  { %1151 = vrcp.f32 %v417_v5 }
 0x47a   :  { %1153 = vrcp.f32 %v421_v6  ;;  %v487_v23 = vpop.permute.xlu1 %486 }
 0x486   :  { %v1152_v9 = vpop.eup %1151 }
 0x487   :  { %v425_v11 = vmul.f32 %v1152_v9, %v1148_v47  ;;  %v1154_v14 = vpop.eup %1153 }
 0x488   :  { %v427_v17 = vmul.f32 %v1154_v14, %v1150_v48 }
 0x489   :  { %v497_v12 = vadd.f32 %v445_v7, %v425_v11  ;;  %v496_v13 = vadd.f32 %v438_v3, %v425_v11  ;;  %v499_v16 = vadd.f32 %v459_v8, %v425_v11  ;;  %v498_v19 = vadd.f32 %v452_v2, %v425_v11 }
 0x48a   :  { %v500_v20 = vadd.f32 %v466_v10, %v427_v17  ;;  %v501_v21 = vadd.f32 %v473_v15, %v427_v17  ;;  %v502_v24 = vadd.f32 %v480_v22, %v427_v17  ;;  %v503_v25 = vadd.f32 %v487_v23, %v427_v17 }
 0x48b   :  { %516 = vperm.xlu1 %1139, %v497_v12   ;;  %513 = vperm.xlu0 %1140, %v496_v13  }
 0x48f   :  { %522 = vperm.xlu1 %1139, %v499_v16   ;;  %519 = vperm.xlu0 %1140, %v498_v19  }
 0x493   :  { %528 = vperm.xlu1 %1139, %v501_v21   ;;  %525 = vperm.xlu0 %1140, %v500_v20  }
 0x497   :  { %531 = vperm.xlu0 %1140, %v502_v24   ;;  %534 = vperm.xlu1 %1139, %v503_v25  }
 0x506   :  { %v514_v26 = vpop.permute.xlu0 %513  ;;  %v517_v27 = vpop.permute.xlu1 %516 }
 0x507   :  { %v539_v28 = vrot.slane %v514_v26, %v1401_v29  ;;  %v543_v30 = vrot.slane %v517_v27, %v1401_v29 }
 0x509   :  { %v568_v35 = vsel %vm368_vm3, %v543_v30, %v539_v28 }
 0x50a   :  { %v520_v31 = vpop.permute.xlu0 %519  ;;  %v523_v32 = vpop.permute.xlu1 %522 }
 0x50b   :  { %v547_v33 = vrot.slane %v520_v31, %v1401_v29  ;;  %v551_v34 = vrot.slane %v523_v32, %v1401_v29 }
 0x50d   :  { %v570_v36 = vsel %vm569_vm5, %v547_v33, %v568_v35 }
 0x50e   :  { %v526_v38 = vpop.permute.xlu0 %525  ;;  %v529_v39 = vpop.permute.xlu1 %528  ;;  %v572_v40 = vsel %vm571_vm6, %v551_v34, %v570_v36 }
 0x50f   :  { %v579_v41 = vsel %vm578_vm7, %v572_v40, -inf  ;;  %v555_v42 = vrot.slane %v526_v38, %v1401_v29  ;;  %v559_v43 = vrot.slane %v529_v39, %v1401_v29 }
 0x510   :  { %580 = vmax.xlane.f32.xlu0 %v579_v41 }
 0x511   :  { %v573_v49 = vsel %vm368_vm3, %v559_v43, %v555_v42 }
 0x512   :  { %v532_v44 = vpop.permute.xlu0 %531  ;;  %v535_v46 = vpop.permute.xlu1 %534 }
 0x513   :  { %v563_v47 = vrot.slane %v532_v44, %v1401_v29  ;;  %v567_v48 = vrot.slane %v535_v46, %v1401_v29 }
 0x515   :  { %v574_v50 = vsel %vm569_vm5, %v563_v47, %v573_v49 }
 0x516   :  { %v575_v51 = vsel %vm571_vm6, %v567_v48, %v574_v50 }
 0x517   :  { %v582_v53 = vsel %vm578_vm7, %v575_v51, -inf }
 0x518   :  { %583 = vmax.xlane.f32.xlu1 %v582_v53 }
 0x599   :  { %v581_v54 = vpop.xlane.xlu0 %580 }
 0x59a   :  { %v590_v55 = vrot.slane %v581_v54, %v1396_v18  ;;  %v594_v56 = vrot.slane %v581_v54, %v1408_v37  ;;  %v598_v57 = vrot.slane %v581_v54, %v1413_v45  ;;  %v602_v58 = vrot.slane %v581_v54, %v1422_v52 }
 0x59c   :  { %v627_v59 = vsub.f32 %v496_v13, %v590_v55  ;;  %v628_v60 = vsub.f32 %v497_v12, %v594_v56  ;;  %v629_v61 = vsub.f32 %v498_v19, %v598_v57  ;;  %v630_v62 = vsub.f32 %v499_v16, %v602_v58 }
 0x59e   :  { %v635_v63 = vmul.f32 1.442695, %v627_v59  ;;  %v637_v1 = vmul.f32 1.442695, %v628_v60  ;;  %v639_v2 = vmul.f32 1.442695, %v629_v61 }
 0x59f   :  { %v641_v3 = vmul.f32 1.442695, %v630_v62 }
 0x5a0   :  { %1155 = vpow2.f32 %v635_v63 }
 0x5a1   :  { %1157 = vpow2.f32 %v637_v1  ;;  %v584_v4 = vpop.xlane.xlu1 %583 }
 0x5a2   :  { %v606_v5 = vrot.slane %v584_v4, %v1396_v18  ;;  %v610_v6 = vrot.slane %v584_v4, %v1408_v37  ;;  %v614_v7 = vrot.slane %v584_v4, %v1413_v45  ;;  %v618_v8 = vrot.slane %v584_v4, %v1422_v52 }
 0x5a3   :  { %1159 = vpow2.f32 %v639_v2 }
 0x5a4   :  { %v631_v9 = vsub.f32 %v500_v20, %v606_v5  ;;  %v632_v10 = vsub.f32 %v501_v21, %v610_v6  ;;  %v633_v11 = vsub.f32 %v502_v24, %v614_v7  ;;  %1161 = vpow2.f32 %v641_v3 }
 0x5a5   :  { %v634_v12 = vsub.f32 %v503_v25, %v618_v8 }
 0x5a6   :  { %v643_v13 = vmul.f32 1.442695, %v631_v9  ;;  %v645_v14 = vmul.f32 1.442695, %v632_v10  ;;  %v647_v15 = vmul.f32 1.442695, %v633_v11 }
 0x5a7   :  { %v649_v16 = vmul.f32 1.442695, %v634_v12 }
 0x5a8   :  { %1163 = vpow2.f32 %v643_v13 }
 0x5a9   :  { %1165 = vpow2.f32 %v645_v14 }
 0x5aa   :  { %1167 = vpow2.f32 %v647_v15 }
 0x5ab   :  { %1169 = vpow2.f32 %v649_v16 }
 0x5ad   :  { %v1462_v17 = vpop.eup %1155 }
 0x5ae   :  { %v1464_v19 = vpop.eup %1157  ;;  %660 = vperm.xlu0 %1140, %v1462_v17  }
 0x5af   :  { %663 = vperm.xlu1 %1139, %v1464_v19  }
 0x5b0   :  { %v1468_v20 = vpop.eup %1159 }
 0x5b1   :  { %v1470_v21 = vpop.eup %1161 }
 0x5b2   :  { %666 = vperm.xlu0 %1140, %v1468_v20  }
 0x5b3   :  { %669 = vperm.xlu1 %1139, %v1470_v21  }
 0x5b5   :  { %v1474_v22 = vpop.eup %1163 }
 0x5b6   :  { %v1476_v23 = vpop.eup %1165  ;;  %672 = vperm.xlu0 %1140, %v1474_v22  }
 0x5b7   :  { %675 = vperm.xlu1 %1139, %v1476_v23   ;;  %v1480_v24 = vpop.eup %1167 }
 0x5b8   :  { %v1482_v25 = vpop.eup %1169 }
 0x5ba   :  { %678 = vperm.xlu0 %1140, %v1480_v24  }
 0x5bb   :  { %681 = vperm.xlu1 %1139, %v1482_v25  }
 0x629   :  { %v661_v26 = vpop.permute.xlu0 %660 }
 0x62a   :  { %v664_v27 = vpop.permute.xlu1 %663  ;;  %v686_v28 = vrot.slane %v661_v26, %v1401_v29 }
 0x62b   :  { %v690_v30 = vrot.slane %v664_v27, %v1401_v29 }
 0x62d   :  { %v667_v31 = vpop.permute.xlu0 %666  ;;  %v715_v34 = vsel %vm368_vm3, %v690_v30, %v686_v28 }
 0x62e   :  { %v694_v32 = vrot.slane %v667_v31, %v1401_v29  ;;  %v670_v33 = vpop.permute.xlu1 %669 }
 0x62f   :  { %v698_v35 = vrot.slane %v670_v33, %v1401_v29 }
 0x630   :  { %v716_v36 = vsel %vm569_vm5, %v694_v32, %v715_v34 }
 0x631   :  { %v673_v38 = vpop.permute.xlu0 %672  ;;  %v717_v39 = vsel %vm571_vm6, %v698_v35, %v716_v36 }
 0x632   :  { %v676_v40 = vpop.permute.xlu1 %675  ;;  %v723_v41 = vsel %vm578_vm7, %v717_v39, 0.0  ;;  %v702_v42 = vrot.slane %v673_v38, %v1401_v29 }
 0x633   :  { %v706_v43 = vrot.slane %v676_v40, %v1401_v29  ;;  %724 = vadd.xlane.f32.xlu0 %v723_v41 }
 0x635   :  { %v679_v44 = vpop.permute.xlu0 %678  ;;  %v718_v48 = vsel %vm368_vm3, %v706_v43, %v702_v42 }
 0x636   :  { %v710_v46 = vrot.slane %v679_v44, %v1401_v29  ;;  %v682_v47 = vpop.permute.xlu1 %681 }
 0x637   :  { %v714_v49 = vrot.slane %v682_v47, %v1401_v29 }
 0x638   :  { %v719_v50 = vsel %vm569_vm5, %v710_v46, %v718_v48 }
 0x639   :  { %v720_v51 = vsel %vm571_vm6, %v714_v49, %v719_v50 }
 0x63a   :  { %v726_v53 = vsel %vm578_vm7, %v720_v51, 0.0 }
 0x63b   :  { %727 = vadd.xlane.f32.xlu1 %v726_v53 }
 0x6bc   :  { %v725_v54 = vpop.xlane.xlu0 %724 }
 0x6bd   :  { %v734_v55 = vrot.slane %v725_v54, %v1396_v18  ;;  %v738_v56 = vrot.slane %v725_v54, %v1408_v37  ;;  %v742_v57 = vrot.slane %v725_v54, %v1413_v45  ;;  %v746_v58 = vrot.slane %v725_v54, %v1422_v52 }
 0x6bf   :  { %1171 = vrcp.f32 %v734_v55 }
 0x6c0   :  { %1173 = vrcp.f32 %v738_v56 }
 0x6c1   :  { %1175 = vrcp.f32 %v742_v57 }
 0x6c2   :  { %1177 = vrcp.f32 %v746_v58 }
 0x6c4   :  { %v728_v59 = vpop.xlane.xlu1 %727 }
 0x6c5   :  { %v750_v60 = vrot.slane %v728_v59, %v1396_v18  ;;  %v754_v61 = vrot.slane %v728_v59, %v1408_v37  ;;  %v758_v62 = vrot.slane %v728_v59, %v1413_v45  ;;  %v762_v63 = vrot.slane %v728_v59, %v1422_v52  ;;  %v787_v45 = vld [vmem:[#allocation5] sm:$0xff] }
 0x6c6   :  { %1120 = vmatpush3.msra.mxu0 %v787_v45 }
 0x6c7   :  { %1179 = vrcp.f32 %v750_v60  ;;  %1124 = vmatprep.subr.mxu0 %v1278_v0 }
 0x6c8   :  { %1181 = vrcp.f32 %v754_v61 }
 0x6c9   :  { %1183 = vrcp.f32 %v758_v62 }
 0x6ca   :  { %1185 = vrcp.f32 %v762_v63 }
 0x6cc   :  { %v1172_v1 = vpop.eup %1171 }
 0x6cd   :  { %v1174_v2 = vpop.eup %1173  ;;  %v772_v3 = vmul.f32 %v1172_v1, %v1462_v17 }
 0x6ce   :  { %v1176_v4 = vpop.eup %1175  ;;  %v774_v5 = vmul.f32 %v1174_v2, %v1464_v19 }
 0x6cf   :  { %v1178_v6 = vpop.eup %1177  ;;  %794 = vperm.xlu0 %1140, %v772_v3   ;;  %v776_v18 = vmul.f32 %v1176_v4, %v1468_v20 }
 0x6d0   :  { %797 = vperm.xlu1 %1139, %v774_v5   ;;  %v778_v37 = vmul.f32 %v1178_v6, %v1470_v21 }
 0x6d3   :  { %800 = vperm.xlu0 %1140, %v776_v18  }
 0x6d4   :  { %v1180_v52 = vpop.eup %1179  ;;  %803 = vperm.xlu1 %1139, %v778_v37  }
 0x6d5   :  { %v1182_v7 = vpop.eup %1181  ;;  %v780_v8 = vmul.f32 %v1180_v52, %v1474_v22 }
 0x6d6   :  { %v1184_v9 = vpop.eup %1183  ;;  %v782_v10 = vmul.f32 %v1182_v7, %v1476_v23 }
 0x6d7   :  { %v1186_v11 = vpop.eup %1185  ;;  %902 = vperm.xlu0 %1140, %v780_v8   ;;  %v784_v12 = vmul.f32 %v1184_v9, %v1480_v24 }
 0x6d8   :  { %905 = vperm.xlu1 %1139, %v782_v10   ;;  %v786_v13 = vmul.f32 %v1186_v11, %v1482_v25  ;;  %v788_v25 = vld [vmem:[#allocation5 + $0x8] sm:$0xff] }
 0x6db   :  { %908 = vperm.xlu0 %1140, %v784_v12  }
 0x6dc   :  { %911 = vperm.xlu1 %1139, %v786_v13  }
 0x74a   :  { %v795_v14 = vpop.permute.xlu0 %794 }
 0x74b   :  { %v798_v15 = vpop.permute.xlu1 %797  ;;  %v808_v16 = vrot.slane %v795_v14, %v1401_v29 }
 0x74c   :  { %v812_v17 = vrot.slane %v798_v15, %v1401_v29 }
 0x74e   :  { %v801_v19 = vpop.permute.xlu0 %800  ;;  %v821_v22 = vsel %vm368_vm3, %v812_v17, %v808_v16 }
 0x74f   :  { %v816_v20 = vrot.slane %v801_v19, %v1401_v29  ;;  %v804_v21 = vpop.permute.xlu1 %803 }
 0x750   :  { %v820_v23 = vrot.slane %v804_v21, %v1401_v29 }
 0x751   :  { %v822_v24 = vsel %vm569_vm5, %v816_v20, %v821_v22 }
 0x752   :  { %v823_v26 = vsel %vm571_vm6, %v820_v23, %v822_v24  ;;  %v903_v27 = vpop.permute.xlu0 %902 }
 0x753   :  { %v906_v28 = vpop.permute.xlu1 %905  ;;  %1122 = vmatmul.mubr.msk.f32.vlgmr.msra.gmra.mxu0 %vm824_vm8, %v823_v26  ;;  %v916_v30 = vrot.slane %v903_v27, %v1401_v29 }
 0x754   :  { %v920_v31 = vrot.slane %v906_v28, %v1401_v29  ;;  %1125 = vmatpush3.msra.mxu0 %v788_v25  ;;  %1126 = vmatprep.mubr.msk.f32.mxu0 %vm1279_vm0, %v1278_v0 }
 0x756   :  { %v909_v32 = vpop.permute.xlu0 %908  ;;  %v929_v35 = vsel %vm368_vm3, %v920_v31, %v916_v30 }
 0x757   :  { %v924_v33 = vrot.slane %v909_v32, %v1401_v29  ;;  %v912_v34 = vpop.permute.xlu1 %911 }
 0x758   :  { %v928_v36 = vrot.slane %v912_v34, %v1401_v29 }
 0x759   :  { %v930_v38 = vsel %vm569_vm5, %v924_v33, %v929_v35 }
 0x75a   :  { %v931_v39 = vsel %vm571_vm6, %v928_v36, %v930_v38 }
 0x75b   :  { %1127 = vmatmul.mubr.msk.f32.vlgmr.msra.gmra.mxu0 %vm824_vm8, %v931_v39 }
 0x813   :  { %v893_v40 = vpop.f32.mrf.mxu0 }
 0x815   :  { %v1123_v41 = vpop.f32.mrf.mxu0 }
 0x81b   :  { %v1000_v42 = vpop.f32.mrf.mxu0 }
 0x81c   :  { %v1006_v0 = vcombine.low %v893_v40, %v1000_v42 }
 0x81d   :  { %v1128_v43 = vpop.f32.mrf.mxu0 }
 0x81e   :  { %1008 = vst [vmem:[#allocation8] sm:$0xff] %v1006_v0 }
 0x81f   :  { %1258 = shalt.err (!%p1255_p5)
}
 0x820   :  { %1018 = dma.vmem_to_hbm [thread:$0]  %s1016_s20, 128, %s1547_s7, [#allocation4]  }
 0x821   :  { %1271 = dma.done.wait [#allocation4], 128  }
 0x822   :  { %1272 = vsyncadd [#allocation4], 4294967168 }
 0x823   :  { %1022 = vsyncpa [#allocation3], 1 }
 0x824   :  { %1023 = vsyncpa [#allocation6], 1 }
 0x825   :  { %1024 = vsyncpa [#allocation4], 1 }

</bundles_post_ra>
